<compile_context>
chip_gen: v5e
topology: v5e:2x2
jax: 0.10.0
libtpu: 0.0.40
codegen_flags: <defaults>
</compile_context>

<pallas_src>
import functools

import jax
import jax.numpy as jnp
from jax.experimental import pallas as pl
from jax.experimental.pallas import tpu as pltpu


def _round_up(x, m):
    return ((x + m - 1) // m) * m


def _sublane_align(dtype):
    """Second-minor (sublane) alignment for a dtype: 8 (f32), 16 (bf16), 32 (8-bit)."""
    itemsize = jnp.dtype(dtype).itemsize
    if itemsize >= 4:
        return 8
    if itemsize == 2:
        return 16
    return 32


def _pick_tile(size_padded, requested, align):
    """Largest multiple of `align` <= `requested` that divides `size_padded`.

    `size_padded` is always a multiple of `align`, so the loop terminates
    (worst case tile == align). Avoids padding arrays up to tile multiples."""
    t = min(requested, size_padded)
    t = max(align, (t // align) * align)
    while size_padded % t:
        t -= align
    return t


def _apply_activation(z, activation):
    if activation == "relu":
        return jnp.maximum(z, 0.0)
    if activation == "sigmoid":
        # exp (EUP) + approximate reciprocal (EUP) keeps the epilogue off the VPU.
        return pl.reciprocal(1.0 + jnp.exp(-z), approx=True)
    return z  # "none": identity (Gaussian mu / logvar heads).


# ---------------------------------------------------------------------------
# Fused whole-stack kernel: all weights resident in VMEM, grid over batch only.
# ---------------------------------------------------------------------------
def _fused_mlp_kernel(*refs, n_hidden, head_activation, output_hidden):
    n_layers = n_hidden + 1
    x_ref = refs[0]
    wb = refs[1:1 + 2 * n_layers]
    out_refs = refs[1 + 2 * n_layers:]

    h = x_ref[...]  # compute dtype (e.g. bf16)
    for i in range(n_hidden):
        w = wb[2 * i][...]
        b = wb[2 * i + 1][...].astype(jnp.float32)
        h = jnp.maximum(
            jnp.dot(h.astype(w.dtype), w, preferred_element_type=jnp.float32) + b,
            0.0,
        )
    if output_hidden:
        out_refs[1][...] = h.astype(out_refs[1].dtype)

    w = wb[2 * n_hidden][...]
    b = wb[2 * n_hidden + 1][...].astype(jnp.float32)
    z = jnp.dot(h.astype(w.dtype), w, preferred_element_type=jnp.float32) + b
    out_refs[0][...] = _apply_activation(z, head_activation).astype(out_refs[0].dtype)


def _fused_forward(x, layers, head_activation, *, compute_dtype, out_dtype,
                   output_hidden=False):
    """Single pallas_call for the whole MLP stack.

    layers = [(w0, b0), ..., (w_{L-1}, b_{L-1}), (w_head, b_head)],
    w_i: [in_dim, out_dim], b_i: [out_dim]."""
    B, K0 = x.shape
    n_hidden = len(layers) - 1
    cdt = compute_dtype or x.dtype
    m_align = _sublane_align(cdt)
    Mp = _round_up(B, m_align)
    Kp0 = _round_up(K0, 128)

    x_p = jnp.pad(x.astype(cdt), ((0, Mp - B), (0, Kp0 - K0)))

    wb_padded = []
    in_dim = K0
    for (w_t, b) in layers:
        Kin, Nout = w_t.shape
        assert Kin == in_dim, (Kin, in_dim)
        Kp, Np = _round_up(Kin, 128), _round_up(Nout, 128)
        # Zero-padded K rows of each weight guarantee padded activation columns
        # of the previous layer never leak into the next matmul.
        wb_padded.append(jnp.pad(w_t.astype(cdt), ((0, Kp - Kin), (0, Np - Nout))))
        wb_padded.append(
            jnp.pad(b.astype(jnp.float32).reshape(1, Nout), ((0, 0), (0, Np - Nout))))
        in_dim = Nout

    N_out = layers[-1][0].shape[1]
    Np_out = _round_up(N_out, 128)
    N_hid = layers[-2][0].shape[1] if n_hidden > 0 else K0
    Np_hid = _round_up(N_hid, 128)

    tm = _pick_tile(Mp, 256, m_align)
    grid = (Mp // tm,)

    in_specs = [pl.BlockSpec((tm, Kp0), lambda i: (i, 0))]
    for arr in wb_padded:  # full-array blocks, constant across the grid
        in_specs.append(pl.BlockSpec(arr.shape, lambda i: (0, 0)))

    out_shape = [jax.ShapeDtypeStruct((Mp, Np_out), out_dtype)]
    out_specs = [pl.BlockSpec((tm, Np_out), lambda i: (i, 0))]
    if output_hidden:
        out_shape.append(jax.ShapeDtypeStruct((Mp, Np_hid), out_dtype))
        out_specs.append(pl.BlockSpec((tm, Np_hid), lambda i: (i, 0)))

    w_bytes = sum(int(a.size) * jnp.dtype(a.dtype).itemsize for a in wb_padded)
    vmem_limit = int(min(max(4 * w_bytes + (8 << 20), 16 << 20), 40 << 20))

    outs = pl.pallas_call(
        functools.partial(
            _fused_mlp_kernel,
            n_hidden=n_hidden,
            head_activation=head_activation,
            output_hidden=output_hidden,
        ),
        out_shape=tuple(out_shape),
        grid_spec=pltpu.PrefetchScalarGridSpec(
            num_scalar_prefetch=0,
            grid=grid,
            in_specs=in_specs,
            out_specs=out_specs,
        ),
        compiler_params=pltpu.CompilerParams(
            dimension_semantics=("parallel",),
            vmem_limit_bytes=vmem_limit,
        ),
    )(x_p, *wb_padded)

    mu = outs[0][:B, :N_out]
    if output_hidden:
        h = outs[1][:B, :N_hid]
        return mu, h
    return mu


# ---------------------------------------------------------------------------
# Tiled fallback for large shapes: M/N/K grid, f32 VMEM accumulator.
# ---------------------------------------------------------------------------
def _linear_act_kernel(x_ref, w_ref, b_ref, o_ref, acc_ref, *, activation):
    k = pl.program_id(2)

    @pl.when(k == 0)
    def _init():
        # Fold the bias into the accumulator init (no per-tile epilogue add).
        acc_ref[...] = jnp.broadcast_to(
            b_ref[...].astype(jnp.float32), acc_ref.shape)

    acc_ref[...] += jnp.dot(
        x_ref[...], w_ref[...], preferred_element_type=jnp.float32)

    @pl.when(k == pl.num_programs(2) - 1)
    def _finalize():
        o_ref[...] = _apply_activation(acc_ref[...], activation).astype(o_ref.dtype)


def _linear_act_padded(x_p, w_p, b_p, activation, *, out_dtype,
                       tm_req=256, tn_req=512, tk_req=1024):
    """activation(x_p @ w_p + b_p) on already hardware-aligned padded arrays."""
    Mp, Kp = x_p.shape
    Kw, Np = w_p.shape
    assert Kp == Kw, (Kp, Kw)

    m_align = _sublane_align(x_p.dtype)
    tm = _pick_tile(Mp, tm_req, m_align)
    tn = _pick_tile(Np, tn_req, 128)
    tk = _pick_tile(Kp, tk_req, 128)

    in_sz = jnp.dtype(x_p.dtype).itemsize
    out_sz = jnp.dtype(out_dtype).itemsize
    # double-buffered inputs + f32 accumulator + double-buffered output tile
    est = (2 * (tm * tk + tk * tn + tn) * in_sz
           + tm * tn * 4 + 2 * tm * tn * out_sz)
    vmem_limit = int(min(max(2 * est, 16 << 20), 40 << 20))  # v7x-safe cap

    grid = (Mp // tm, Np // tn, Kp // tk)
    return pl.pallas_call(
        functools.partial(_linear_act_kernel, activation=activation),
        out_shape=jax.ShapeDtypeStruct((Mp, Np), out_dtype),
        grid_spec=pltpu.PrefetchScalarGridSpec(
            num_scalar_prefetch=0,
            grid=grid,
            in_specs=[
                pl.BlockSpec((tm, tk), lambda i, j, k: (i, k)),
                pl.BlockSpec((tk, tn), lambda i, j, k: (k, j)),
                pl.BlockSpec((1, tn), lambda i, j, k: (0, j)),
            ],
            out_specs=pl.BlockSpec((tm, tn), lambda i, j, k: (i, j)),
            scratch_shapes=[pltpu.VMEM((tm, tn), jnp.float32)],
        ),
        compiler_params=pltpu.CompilerParams(
            dimension_semantics=("parallel", "parallel", "arbitrary"),
            vmem_limit_bytes=vmem_limit,
        ),
    )(x_p, w_p, b_p)


def linear_act(x, w_t, b, activation="none", *, compute_dtype=jnp.bfloat16,
               out_dtype=None, tm=256, tn=512, tk=1024):
    """Fused y = activation(x @ w_t + b). x: [B,K], w_t: [K,N], b: [N]."""
    B, K = x.shape
    Kw, N = w_t.shape
    assert K == Kw, (K, Kw)
    out_dtype = out_dtype or x.dtype

    if compute_dtype is not None:
        x = x.astype(compute_dtype)
        w_t = w_t.astype(compute_dtype)

    m_align = _sublane_align(x.dtype)
    Mp, Kp, Np = _round_up(B, m_align), _round_up(K, 128), _round_up(N, 128)
    x_p = jnp.pad(x, ((0, Mp - B), (0, Kp - K)))
    w_p = jnp.pad(w_t, ((0, Kp - K), (0, Np - N)))
    b_p = jnp.pad(b.astype(jnp.float32).reshape(1, N), ((0, 0), (0, Np - N)))

    out = _linear_act_padded(x_p, w_p, b_p, activation, out_dtype=out_dtype,
                             tm_req=tm, tn_req=tn, tk_req=tk)
    return out[:B, :N]


def _layered_forward(x, layers, head_activation, *, compute_dtype, out_dtype,
                     output_hidden=False):
    """Large-shape fallback: one tiled kernel per layer, activations kept in
    their padded layout (padded once on input, sliced once on output)."""
    B, K0 = x.shape
    n_hidden = len(layers) - 1
    cdt = compute_dtype or x.dtype
    m_align = _sublane_align(cdt)
    Mp = _round_up(B, m_align)
    Kp0 = _round_up(K0, 128)
    h_p = jnp.pad(x.astype(cdt), ((0, Mp - B), (0, Kp0 - K0)))

    z_p = None
    for li, (w_t, b) in enumerate(layers):
        Kin, Nout = w_t.shape
        Kp, Np = _round_up(Kin, 128), _round_up(Nout, 128)
        w_p = jnp.pad(w_t.astype(cdt), ((0, Kp - Kin), (0, Np - Nout)))
        b_p = jnp.pad(b.astype(jnp.float32).reshape(1, Nout), ((0, 0), (0, Np - Nout)))
        is_head = li == len(layers) - 1
        act = head_activation if is_head else "relu"
        layer_out_dtype = out_dtype if is_head else cdt
        res = _linear_act_padded(h_p, w_p, b_p, act, out_dtype=layer_out_dtype)
        if is_head:
            z_p = res
        else:
            h_p = res

    N_out = layers[-1][0].shape[1]
    z = z_p[:B, :N_out]
    if output_hidden:
        N_hid = layers[-2][0].shape[1] if n_hidden > 0 else K0
        return z, h_p[:B, :N_hid].astype(out_dtype)
    return z


def _total_padded_param_bytes(layers, compute_dtype):
    itemsize = jnp.dtype(compute_dtype).itemsize
    total = 0
    for (w_t, _) in layers:
        Kp = _round_up(w_t.shape[0], 128)
        Np = _round_up(w_t.shape[1], 128)
        total += Kp * Np * itemsize + Np * 4
    return total


# ---------------------------------------------------------------------------
# VariationalLayer forward: hidden stack (Linear + ReLU) x nlayers, then a
# Bernoulli output head (Linear + Sigmoid), returning (mu,) like the module.
# ---------------------------------------------------------------------------
def variational_layer_forward(x, params, output_hidden=False,
                              compute_dtype=jnp.bfloat16):
    # TODO(synk): phidden['batch_norm'] (nn.BatchNorm1d) path not implemented.
    # TODO(synk): CategoricalLayer (Softmax head) needs a cross-N-tile
    # normalization epilogue; GaussianLayer would reuse activation="none" twice.
    if isinstance(x, (list, tuple)):
        ins = jnp.concatenate(list(x), axis=1)  # mirrors torch.cat(x, 1)
    else:
        ins = x

    out_dtype = ins.dtype
    layers = list(params["hidden"]) + [params["out"]]
    head_activation = "sigmoid"  # Bernoulli head
    cdt = compute_dtype or ins.dtype

    if _total_padded_param_bytes(layers, cdt) <= (4 << 20):
        res = _fused_forward(ins, layers, head_activation,
                             compute_dtype=compute_dtype, out_dtype=out_dtype,
                             output_hidden=output_hidden)
    else:
        res = _layered_forward(ins, layers, head_activation,
                               compute_dtype=compute_dtype, out_dtype=out_dtype,
                               output_hidden=output_hidden)

    if output_hidden:
        mu, h = res
        return (mu,), h
    return (res,)


def _init_linear(key, in_dim, out_dim):
    """nn.Linear-style uniform init; returns (W.T [in,out], b [out])."""
    kw, kb = jax.random.split(key)
    bound = 1.0 / (in_dim ** 0.5)
    w = jax.random.uniform(kw, (out_dim, in_dim), jnp.float32, -bound, bound)
    b = jax.random.uniform(kb, (out_dim,), jnp.float32, -bound, bound)
    return w.T, b


if __name__ == "__main__":
    # Small shapes consistent with the module: batch=2, input_dim=32,
    # hidden dim=64 with nlayers=2, Bernoulli output dim=48.
    B, input_dim, hidden_dim, nlayers, output_dim = 2, 32, 64, 2, 48

    key = jax.random.PRNGKey(0)
    kx, k0, k1, k2 = jax.random.split(key, 4)

    x = jax.random.normal(kx, (B, input_dim), dtype=jnp.float32)
    params = {
        "hidden": [
            _init_linear(k0, input_dim, hidden_dim),
            _init_linear(k1, hidden_dim, hidden_dim),
        ][:nlayers],
        "out": _init_linear(k2, hidden_dim, output_dim),
    }

    # Pure-JAX reference with matching bf16 MXU-operand casts (f32 accumulate).
    def ref_forward(x, params, cdt):
        def dense(h, w, b):
            return jnp.dot(h.astype(cdt), w.astype(cdt),
                           preferred_element_type=jnp.float32) + b
        h = x
        for (w_t, b) in params["hidden"]:
            h = jnp.maximum(dense(h, w_t, b), 0.0)
        w_out, b_out = params["out"]
        return jax.nn.sigmoid(dense(h, w_out, b_out)), h

    mu_ref, h_ref = ref_forward(x, params, jnp.bfloat16)

    # 1) Fused whole-stack kernel (default bf16 compute).
    (mu,) = variational_layer_forward(x, params)
    mu = jax.block_until_ready(mu)
    assert mu.shape == (B, output_dim)
    assert jnp.allclose(mu, mu_ref, atol=5e-3, rtol=5e-3)

    # 2) output_hidden path (second kernel output).
    (mu2,), h = variational_layer_forward(x, params, output_hidden=True)
    h = jax.block_until_ready(h)
    assert h.shape == (B, hidden_dim)
    assert jnp.allclose(mu2, mu_ref, atol=5e-3, rtol=5e-3)
    assert jnp.allclose(h, h_ref, atol=1e-2, rtol=1e-2)

    # 3) Tiled fallback kernel (grid > 1 in all three axes).
    kx2, kw2, kb2 = jax.random.split(jax.random.PRNGKey(1), 3)
    x2 = jax.random.normal(kx2, (32, 320), jnp.float32)
    w2 = jax.random.normal(kw2, (320, 256), jnp.float32) * 0.05
    b2 = jax.random.normal(kb2, (256,), jnp.float32)
    y2 = linear_act(x2, w2, b2, activation="relu",
                    compute_dtype=jnp.bfloat16, tm=16, tn=128, tk=128)
    y2 = jax.block_until_ready(y2)
    y2_ref = jnp.maximum(
        jnp.dot(x2.astype(jnp.bfloat16), w2.astype(jnp.bfloat16),
                preferred_element_type=jnp.float32) + b2, 0.0)
    assert y2.shape == (32, 256)
    assert jnp.allclose(y2, y2_ref, atol=5e-3, rtol=5e-3)

    print("KERNEL_OK")
</pallas_src>

<mosaic_0001>
module attributes {stable_mosaic.version = 11 : i64} {
  func.func @_fused_mlp_kernel(%arg0: i32, %arg1: memref<16x128xbf16, #tpu.memory_space<vmem>>, %arg2: memref<128x128xbf16, #tpu.memory_space<vmem>>, %arg3: memref<1x128xf32, #tpu.memory_space<vmem>>, %arg4: memref<128x128xbf16, #tpu.memory_space<vmem>>, %arg5: memref<1x128xf32, #tpu.memory_space<vmem>>, %arg6: memref<128x128xbf16, #tpu.memory_space<vmem>>, %arg7: memref<1x128xf32, #tpu.memory_space<vmem>>, %arg8: memref<16x128xf32, #tpu.memory_space<vmem>>) attributes {dimension_semantics = [#tpu.dimension_semantics<parallel>], iteration_bounds = array<i64: 1>, scalar_prefetch = 0 : i64, scratch_operands = 0 : i64, tpu.core_type = #tpu.core_type<tc>, window_params = [{transform_indices = @transform_0, window_bounds = array<i64: 16, 128>}, {pipeline_mode = #tpu.pipeline_mode<synchronous>, transform_indices = @transform_1, window_bounds = array<i64: 128, 128>}, {pipeline_mode = #tpu.pipeline_mode<synchronous>, transform_indices = @transform_2, window_bounds = array<i64: 1, 128>}, {pipeline_mode = #tpu.pipeline_mode<synchronous>, transform_indices = @transform_3, window_bounds = array<i64: 128, 128>}, {pipeline_mode = #tpu.pipeline_mode<synchronous>, transform_indices = @transform_4, window_bounds = array<i64: 1, 128>}, {pipeline_mode = #tpu.pipeline_mode<synchronous>, transform_indices = @transform_5, window_bounds = array<i64: 128, 128>}, {pipeline_mode = #tpu.pipeline_mode<synchronous>, transform_indices = @transform_6, window_bounds = array<i64: 1, 128>}, {transform_indices = @transform_7, window_bounds = array<i64: 16, 128>}]} {
    %c0 = arith.constant 0 : index
    %c0_0 = arith.constant 0 : index
    %0 = vector.load %arg1[%c0, %c0_0] : memref<16x128xbf16, #tpu.memory_space<vmem>>, vector<16x128xbf16>
    %c0_1 = arith.constant 0 : index
    %c0_2 = arith.constant 0 : index
    %1 = vector.load %arg2[%c0_1, %c0_2] : memref<128x128xbf16, #tpu.memory_space<vmem>>, vector<128x128xbf16>
    %c0_3 = arith.constant 0 : index
    %c0_4 = arith.constant 0 : index
    %2 = vector.load %arg3[%c0_3, %c0_4] : memref<1x128xf32, #tpu.memory_space<vmem>>, vector<1x128xf32>
    %cst = arith.constant dense<0.000000e+00> : vector<16x128xf32>
    %3 = tpu.matmul %0, %1, %cst {dimension_numbers = #tpu.dot_dimension_numbers<[1], [0], [0], [1], [0, 0, 1, 1], [], []>} : vector<16x128xbf16>, vector<128x128xbf16>, vector<16x128xf32> -> vector<16x128xf32>
    %4 = vector.broadcast %2 : vector<1x128xf32> to vector<16x128xf32>
    %5 = arith.addf %3, %4 : vector<16x128xf32>
    %cst_5 = arith.constant 0.000000e+00 : f32
    %6 = vector.broadcast %cst_5 : f32 to vector<16x128xf32>
    %7 = arith.maximumf %5, %6 : vector<16x128xf32>
    %c0_6 = arith.constant 0 : index
    %c0_7 = arith.constant 0 : index
    %8 = vector.load %arg4[%c0_6, %c0_7] : memref<128x128xbf16, #tpu.memory_space<vmem>>, vector<128x128xbf16>
    %c0_8 = arith.constant 0 : index
    %c0_9 = arith.constant 0 : index
    %9 = vector.load %arg5[%c0_8, %c0_9] : memref<1x128xf32, #tpu.memory_space<vmem>>, vector<1x128xf32>
    %10 = arith.truncf %7 : vector<16x128xf32> to vector<16x128xbf16>
    %cst_10 = arith.constant dense<0.000000e+00> : vector<16x128xf32>
    %11 = tpu.matmul %10, %8, %cst_10 {dimension_numbers = #tpu.dot_dimension_numbers<[1], [0], [0], [1], [0, 0, 1, 1], [], []>} : vector<16x128xbf16>, vector<128x128xbf16>, vector<16x128xf32> -> vector<16x128xf32>
    %12 = vector.broadcast %9 : vector<1x128xf32> to vector<16x128xf32>
    %13 = arith.addf %11, %12 : vector<16x128xf32>
    %cst_11 = arith.constant 0.000000e+00 : f32
    %14 = vector.broadcast %cst_11 : f32 to vector<16x128xf32>
    %15 = arith.maximumf %13, %14 : vector<16x128xf32>
    %c0_12 = arith.constant 0 : index
    %c0_13 = arith.constant 0 : index
    %16 = vector.load %arg6[%c0_12, %c0_13] : memref<128x128xbf16, #tpu.memory_space<vmem>>, vector<128x128xbf16>
    %c0_14 = arith.constant 0 : index
    %c0_15 = arith.constant 0 : index
    %17 = vector.load %arg7[%c0_14, %c0_15] : memref<1x128xf32, #tpu.memory_space<vmem>>, vector<1x128xf32>
    %18 = arith.truncf %15 : vector<16x128xf32> to vector<16x128xbf16>
    %cst_16 = arith.constant dense<0.000000e+00> : vector<16x128xf32>
    %19 = tpu.matmul %18, %16, %cst_16 {dimension_numbers = #tpu.dot_dimension_numbers<[1], [0], [0], [1], [0, 0, 1, 1], [], []>} : vector<16x128xbf16>, vector<128x128xbf16>, vector<16x128xf32> -> vector<16x128xf32>
    %20 = vector.broadcast %17 : vector<1x128xf32> to vector<16x128xf32>
    %21 = arith.addf %19, %20 : vector<16x128xf32>
    %cst_17 = arith.constant 0.000000e+00 : f32
    %22 = vector.broadcast %cst_17 : f32 to vector<16x128xf32>
    %23 = arith.subf %22, %21 : vector<16x128xf32>
    %24 = math.exp %23 : vector<16x128xf32>
    %cst_18 = arith.constant 1.000000e+00 : f32
    %25 = vector.broadcast %cst_18 : f32 to vector<16x128xf32>
    %26 = arith.addf %25, %24 : vector<16x128xf32>
    %27 = tpu.reciprocal %26 {approx = true} : vector<16x128xf32> -> vector<16x128xf32>
    %c0_19 = arith.constant 0 : index
    %c0_20 = arith.constant 0 : index
    %28 = vector.load %arg8[%c0_19, %c0_20] : memref<16x128xf32, #tpu.memory_space<vmem>>, vector<16x128xf32>
    tpu.vector_store %arg8[%c0_19, %c0_20], %27 {strides = array<i32>} : memref<16x128xf32, #tpu.memory_space<vmem>>, vector<16x128xf32>,
    return
  }
  func.func @transform_0(%arg0: i32) -> (i32, i32) {
    %c0_i32 = arith.constant 0 : i32
    %c0_i32_0 = arith.constant 0 : i32
    return %arg0, %c0_i32 : i32, i32
  }
  func.func @transform_1(%arg0: i32) -> (i32, i32) {
    %c0_i32 = arith.constant 0 : i32
    %c0_i32_0 = arith.constant 0 : i32
    %c0_i32_1 = arith.constant 0 : i32
    return %c0_i32, %c0_i32_0 : i32, i32
  }
  func.func @transform_2(%arg0: i32) -> (i32, i32) {
    %c0_i32 = arith.constant 0 : i32
    %c0_i32_0 = arith.constant 0 : i32
    %c0_i32_1 = arith.constant 0 : i32
    return %c0_i32, %c0_i32_0 : i32, i32
  }
  func.func @transform_3(%arg0: i32) -> (i32, i32) {
    %c0_i32 = arith.constant 0 : i32
    %c0_i32_0 = arith.constant 0 : i32
    %c0_i32_1 = arith.constant 0 : i32
    return %c0_i32, %c0_i32_0 : i32, i32
  }
  func.func @transform_4(%arg0: i32) -> (i32, i32) {
    %c0_i32 = arith.constant 0 : i32
    %c0_i32_0 = arith.constant 0 : i32
    %c0_i32_1 = arith.constant 0 : i32
    return %c0_i32, %c0_i32_0 : i32, i32
  }
  func.func @transform_5(%arg0: i32) -> (i32, i32) {
    %c0_i32 = arith.constant 0 : i32
    %c0_i32_0 = arith.constant 0 : i32
    %c0_i32_1 = arith.constant 0 : i32
    return %c0_i32, %c0_i32_0 : i32, i32
  }
  func.func @transform_6(%arg0: i32) -> (i32, i32) {
    %c0_i32 = arith.constant 0 : i32
    %c0_i32_0 = arith.constant 0 : i32
    %c0_i32_1 = arith.constant 0 : i32
    return %c0_i32, %c0_i32_0 : i32, i32
  }
  func.func @transform_7(%arg0: i32) -> (i32, i32) {
    %c0_i32 = arith.constant 0 : i32
    %c0_i32_0 = arith.constant 0 : i32
    return %arg0, %c0_i32 : i32, i32
  }
}

</mosaic_0001>

<bundles_post_ra>
// kernel: tpu_custom_call.1
= control target key start
LH: loop header
LB: loop body
LE: loop exit
PB: predicated region body
PF: predicated region fallthrough
CT: control target
= control target key end

     0   :  { %12 = vsyncpa [#allocation3], 0  ;;  %s729_s0 = inlined_call_operand.hbm [shape: bf16[16,128], index: 0, kind: input, shape index: {}]   ;;  %s730_s1 = inlined_call_operand.hbm [shape: bf16[128,128], index: 1, kind: input, shape index: {}]   ;;  %s731_s2 = inlined_call_operand.vmem [shape: f32[1,128], index: 2, kind: input, shape index: {}]   ;;  %s732_s3 = inlined_call_operand.hbm [shape: bf16[128,128], index: 3, kind: input, shape index: {}]   ;;  %s733_s4 = inlined_call_operand.vmem [shape: f32[1,128], index: 4, kind: input, shape index: {}]   ;;  %s734_s5 = inlined_call_operand.hbm [shape: bf16[128,128], index: 5, kind: input, shape index: {}]   ;;  %s735_s6 = inlined_call_operand.vmem [shape: f32[1,128], index: 6, kind: input, shape index: {}]   ;;  %s736_s7 = inlined_call_operand.hbm [shape: f32[16,128], index: 7, kind: output, shape index: {}]  }
   0x1   :  { %13 = vsyncpa [#allocation6], 0 }
   0x2   :  { %14 = vsyncpa [#allocation9], 0 }
   0x3   :  { %15 = vsyncpa [#allocation4], 0  ;;  %s33_s26 = sshll.u32 %s730_s1, 4  ;;  %s656_s27 = smov [#allocation5]   ;;  %s34_s26 = int_to_ptr.hbm [resolvable:$true] %s33_s26 }
   0x4   :  { %s35_s28 = sshll.u32 %s656_s27, 4  ;;  %s20_s8 = sshll.u32 %s729_s0, 4  ;;  %s36_s28 = int_to_ptr.vmem [resolvable:$true] %s35_s28  ;;  %s21_s8 = int_to_ptr.hbm [resolvable:$true] %s20_s8 }
   0x5   :  { %s657_s9 = smov 64   ;;  %s658_s10 = smov 4  }
   0x6   :  { %41 = dma.hbm_to_vmem [thread:$0]  %s34_s26, 1024, %s36_s28, [#allocation6], %s657_s9, %s657_s9, %s658_s10  }
   0x7   :  { %s659_s11 = smov [#allocation2]   ;;  %s48_s15 = sshll.u32 %s732_s3, 4  ;;  %s49_s15 = int_to_ptr.hbm [resolvable:$true] %s48_s15 }
   0x8   :  { %s22_s12 = sshll.u32 %s659_s11, 4  ;;  %s63_s17 = sshll.u32 %s734_s5, 4  ;;  %s23_s12 = int_to_ptr.vmem [resolvable:$true] %s22_s12  ;;  %s64_s17 = int_to_ptr.hbm [resolvable:$true] %s63_s17 }
   0x9   :  { %28 = dma.hbm_to_vmem [thread:$0]  %s21_s8, 128, %s23_s12, [#allocation3], %s657_s9, %s657_s9, %s658_s10  }
   0xa   :  { %s660_s18 = smov [#allocation7]   ;;  %s661_s0 = smov [#allocation8]  }
   0xb   :  { %s50_s19 = sshll.u32 %s660_s18, 4  ;;  %s65_s20 = sshll.u32 %s661_s0, 4  ;;  %s51_s19 = int_to_ptr.vmem [resolvable:$true] %s50_s19  ;;  %s66_s20 = int_to_ptr.vmem [resolvable:$true] %s65_s20 }
   0xc   :  { %56 = dma.hbm_to_vmem [thread:$0]  %s49_s15, 1024, %s51_s19, [#allocation6], %s657_s9, %s657_s9, %s658_s10  }
   0xd   :  { %71 = dma.hbm_to_vmem [thread:$0]  %s64_s17, 1024, %s66_s20, [#allocation9], %s657_s9, %s657_s9, %s658_s10  }
   0xe   :  { %648 = dma.done.wait [#allocation3], 128  }
   0xf   :  { %649 = vsyncadd [#allocation3], 4294967168 }
  0x10   :  { %650 = dma.done.wait [#allocation6], 2048  }
  0x11   :  { %651 = vsyncadd [#allocation6], 4294965248 }
  0x12   :  { %652 = dma.done.wait [#allocation9], 1024  }
  0x13   :  { %653 = vsyncadd [#allocation9], 4294966272  ;;  %v491_v0 = vld [vmem:[#allocation5 + $0x38] sm:$0xff]  ;;  %v490_v1 = vld [vmem:[#allocation5 + $0x30] sm:$0xff]  ;;  %s368_s26 = sshll.u32 %s736_s7, 4  ;;  %s663_s27 = smov 128   ;;  %s369_s26 = int_to_ptr.hbm [resolvable:$true] %s368_s26 }
  0x14   :  { %166 = vmatpush.bf16.msra.mxu0 %v491_v0  ;;  %v499_v2 = vld [vmem:[#allocation7 + $0x38] sm:$0xff]  ;;  %v498_v3 = vld [vmem:[#allocation7 + $0x30] sm:$0xff]  ;;  %v489_v4 = vld [vmem:[#allocation5 + $0x28] sm:$0xff]  ;;  %s664_s28 = smov 8  }
  0x15   :  { %251 = vmatpush.bf16.msra.mxu1 %v499_v2  ;;  %v497_v5 = vld [vmem:[#allocation7 + $0x28] sm:$0xff]  ;;  %v488_v6 = vld [vmem:[#allocation5 + $0x20] sm:$0xff]  ;;  %v487_v8 = vld [vmem:[#allocation5 + $0x18] sm:$0xff] }
  0x16   :  { %v496_v7 = vld [vmem:[#allocation7 + $0x20] sm:$0xff]  ;;  %v486_v9 = vld [vmem:[#allocation5 + $0x10] sm:$0xff]  ;;  %v485_v10 = vld [vmem:[#allocation5 + $0x8] sm:$0xff] }
  0x17   :  { %v484_v11 = vld [vmem:[#allocation5] sm:$0xff]  ;;  %v483_v12 = vld [vmem:[#allocation2] sm:$0xff]  ;;  %v494_v14 = vld [vmem:[#allocation7 + $0x10] sm:$0xff] }
  0x18   :  { %167 = vmatpush.bf16.msra.mxu0 %v490_v1  ;;  %v495_v13 = vld [vmem:[#allocation7 + $0x18] sm:$0xff]  ;;  %v493_v15 = vld [vmem:[#allocation7 + $0x8] sm:$0xff]  ;;  %v492_v16 = vld [vmem:[#allocation7] sm:$0xff] }
  0x19   :  { %252 = vmatpush.bf16.msra.mxu1 %v498_v3  ;;  %v507_v17 = vld [vmem:[#allocation8 + $0x38] sm:$0xff]  ;;  %v506_v18 = vld [vmem:[#allocation8 + $0x30] sm:$0xff]  ;;  %v505_v19 = vld [vmem:[#allocation8 + $0x28] sm:$0xff] }
  0x1a   :  { %336 = vmatpush.bf16.msra.mxu2 %v507_v17  ;;  %v504_v20 = vld [vmem:[#allocation8 + $0x20] sm:$0xff]  ;;  %v517_v22 = vld [vmem:[%s731_s2] ss:$0 sm:$0xff]  ;;  %v502_v30 = vld [vmem:[#allocation8 + $0x10] sm:$0xff] }
  0x1b   :  { %v503_v29 = vld [vmem:[#allocation8 + $0x18] sm:$0xff]  ;;  %v501_v31 = vld [vmem:[#allocation8 + $0x8] sm:$0xff]  ;;  %v500_v32 = vld [vmem:[#allocation8] sm:$0xff] }
  0x1c   :  { %168 = vmatpush.bf16.msra.mxu0 %v489_v4  ;;  %v518_v34 = vld [vmem:[%s733_s4] ss:$0 sm:$0xff]  ;;  %s662_s4 = smov [#allocation10]  }
  0x1d   :  { %253 = vmatpush.bf16.msra.mxu1 %v497_v5  ;;  %v519_v41 = vld [vmem:[%s735_s6] ss:$0 sm:$0xff]  ;;  %s366_s6 = sshll.u32 %s662_s4, 4  ;;  %s367_s6 = int_to_ptr.vmem [resolvable:$true] %s366_s6 }
  0x1e   :  { %337 = vmatpush.bf16.msra.mxu2 %v506_v18 }
  0x20   :  { %169 = vmatpush.bf16.msra.mxu0 %v488_v6 }
  0x21   :  { %254 = vmatpush.bf16.msra.mxu1 %v496_v7 }
  0x22   :  { %338 = vmatpush.bf16.msra.mxu2 %v505_v19 }
  0x24   :  { %170 = vmatpush.bf16.msra.mxu0 %v487_v8 }
  0x25   :  { %255 = vmatpush.bf16.msra.mxu1 %v495_v13 }
  0x26   :  { %339 = vmatpush.bf16.msra.mxu2 %v504_v20 }
  0x28   :  { %171 = vmatpush.bf16.msra.mxu0 %v486_v9 }
  0x29   :  { %256 = vmatpush.bf16.msra.mxu1 %v494_v14 }
  0x2a   :  { %340 = vmatpush.bf16.msra.mxu2 %v503_v29 }
  0x2c   :  { %172 = vmatpush.bf16.msra.mxu0 %v485_v10 }
  0x2d   :  { %257 = vmatpush.bf16.msra.mxu1 %v493_v15 }
  0x2e   :  { %341 = vmatpush.bf16.msra.mxu2 %v502_v30 }
  0x30   :  { %173 = vmatpush.bf16.msra.mxu0 %v484_v11 }
  0x31   :  { %258 = vmatpush.bf16.msra.mxu1 %v492_v16 }
  0x32   :  { %342 = vmatpush.bf16.msra.mxu2 %v501_v31 }
  0x33   :  { %174 = vmatmul.bf16.vlgmr.msra.gmra.mxu0 %v483_v12 }
  0x36   :  { %343 = vmatpush.bf16.msra.mxu2 %v500_v32 }
  0xb0   :  { %v175_v21 = vpop.f32.mrf.mxu0 }
  0xb1   :  { %v176_v23 = vadd.f32 %v517_v22, %v175_v21 }
  0xb3   :  { %v180_v26 = vmax.f32 %v176_v23, 0.0 }
  0xb8   :  { %v177_v24 = vpop.f32.mrf.mxu0 }
  0xb9   :  { %v178_v25 = vadd.f32 %v517_v22, %v177_v24 }
  0xbb   :  { %v181_v27 = vmax.f32 %v178_v25, 0.0 }
  0xbd   :  { %v199_v28 = vpack.c.bf16 %v181_v27, %v180_v26 }
  0xbf   :  { %259 = vmatmul.bf16.vlgmr.msra.gmra.mxu1 %v199_v28 }
 0x13c   :  { %v260_v33 = vpop.f32.mrf.mxu1 }
 0x13d   :  { %v261_v35 = vadd.f32 %v518_v34, %v260_v33 }
 0x13f   :  { %v265_v38 = vmax.f32 %v261_v35, 0.0 }
 0x144   :  { %v262_v36 = vpop.f32.mrf.mxu1 }
 0x145   :  { %v263_v37 = vadd.f32 %v518_v34, %v262_v36 }
 0x147   :  { %v266_v39 = vmax.f32 %v263_v37, 0.0 }
 0x149   :  { %v284_v40 = vpack.c.bf16 %v266_v39, %v265_v38 }
 0x14b   :  { %344 = vmatmul.bf16.vlgmr.msra.gmra.mxu2 %v284_v40 }
 0x1ce   :  { %v345_v42 = vpop.f32.mrf.mxu2 }
 0x1cf   :  { %v346_v43 = vadd.f32 %v519_v41, %v345_v42 }
 0x1d1   :  { %v350_v44 = vsub.f32 0.0, %v346_v43 }
 0x1d3   :  { %v352_v45 = vmul.f32 1.442695, %v350_v44 }
 0x1d5   :  { %520 = vpow2.f32 %v352_v45 }
 0x1d6   :  { %v347_v46 = vpop.f32.mrf.mxu2 }
 0x1d7   :  { %v348_v47 = vadd.f32 %v519_v41, %v347_v46 }
 0x1d9   :  { %v351_v48 = vsub.f32 0.0, %v348_v47 }
 0x1db   :  { %v521_v49 = vpop.eup %520  ;;  %v354_v50 = vmul.f32 1.442695, %v351_v48 }
 0x1dc   :  { %v356_v51 = vadd.f32 1.0, %v521_v49 }
 0x1dd   :  { %522 = vpow2.f32 %v354_v50 }
 0x1de   :  { %524 = vrcp.f32 %v356_v51 }
 0x1e3   :  { %v523_v52 = vpop.eup %522 }
 0x1e4   :  { %v525_v53 = vpop.eup %524  ;;  %v357_v54 = vadd.f32 1.0, %v523_v52 }
 0x1e5   :  { %360 = vst [vmem:[#allocation10] sm:$0xff] %v525_v53 }
 0x1e6   :  { %526 = vrcp.f32 %v357_v54 }
 0x1ec   :  { %v527_v55 = vpop.eup %526 }
 0x1ed   :  { %361 = vst [vmem:[#allocation10 + $0x8] sm:$0xff] %v527_v55 }
 0x1ee   :  { %374 = dma.vmem_to_hbm [thread:$0]  %s367_s6, 256, %s369_s26, [#allocation4], %s663_s27, %s663_s27, %s664_s28  }
 0x1ef   :  { %654 = dma.done.wait [#allocation4], 256  }
 0x1f0   :  { %655 = vsyncadd [#allocation4], 4294967040 }
 0x1f1   :  { %379 = vsyncpa [#allocation3], 1 }
 0x1f2   :  { %380 = vsyncpa [#allocation6], 1 }
 0x1f3   :  { %381 = vsyncpa [#allocation9], 1 }
 0x1f4   :  { %382 = vsyncpa [#allocation4], 1 }

</bundles_post_ra>
